<compile_context>
chip_gen: v7x
topology: tpu7x:2x2x1
jax: 0.10.0
libtpu: 0.0.40
codegen_flags: <defaults>
</compile_context>

<pallas_src>
import functools
import math

import jax
import jax.numpy as jnp
from jax.experimental import pallas as pl
from jax.experimental.pallas import tpu as pltpu


# ----------------------------------------------------------------------------
# in-kernel helpers
# ----------------------------------------------------------------------------
def _gelu(x):
    # tanh-approx GELU (PyTorch nn.GELU default is exact erf; ~1e-3 drift).
    c = math.sqrt(2.0 / math.pi)
    return 0.5 * x * (1.0 + jnp.tanh(c * (x + 0.044715 * x * x * x)))


def _layer_norm(x, g, b, eps=1e-5):
    mu = jnp.mean(x, axis=-1, keepdims=True)
    var = jnp.mean((x - mu) ** 2, axis=-1, keepdims=True)
    return (x - mu) * jax.lax.rsqrt(var + eps) * g + b


_W_ORDER = ('w_qkv', 'b_qkv', 'w_o', 'b_o', 'ln1_g', 'ln1_b',
            'w_ff1', 'b_ff1', 'w_ff2', 'b_ff2', 'ln2_g', 'ln2_b')


# ----------------------------------------------------------------------------
# Kernel 1: full transformer encoder stack, grid = (batch, n_layers)
#   - h stays resident in VMEM scratch across the layer axis
#   - only the mean-pooled activation is emitted (that is all the head uses)
# ----------------------------------------------------------------------------
def encoder_stack_kernel(h_ref, wqkv_ref, bqkv_ref, wo_ref, bo_ref,
                         ln1g_ref, ln1b_ref, w1_ref, b1_ref, w2_ref, b2_ref,
                         ln2g_ref, ln2b_ref, pooled_ref, h_acc, *, n_head):
    layer = pl.program_id(1)

    @pl.when(layer == 0)
    def _():
        h_acc[...] = h_ref[...].astype(jnp.float32)

    h = h_acc[...]                                       # [S, D] f32 (resident)
    S, D = h.shape
    dh = D // n_head
    scale = 1.0 / math.sqrt(dh)

    h_bf = h.astype(jnp.bfloat16)
    qkv = jnp.dot(h_bf, wqkv_ref[...],
                  preferred_element_type=jnp.float32) + bqkv_ref[...]   # [S,3D]
    q = qkv[:, 0:D]
    k = qkv[:, D:2 * D]
    v = qkv[:, 2 * D:3 * D]

    # Per-head scores / contexts, then a SINGLE output-projection matmul over
    # the lane-concatenated contexts (instead of n_head K=dh matmuls).
    # TODO(synk): at production sizes (dh >= 128) batch the heads into one
    # einsum / flash-style tiling instead of a python loop over heads.
    ctxs = []
    for hh in range(n_head):
        lo = hh * dh
        qh = q[:, lo:lo + dh].astype(jnp.bfloat16)
        kh = k[:, lo:lo + dh].astype(jnp.bfloat16)
        vh = v[:, lo:lo + dh].astype(jnp.bfloat16)
        s = jax.lax.dot_general(qh, kh, (((1,), (1,)), ((), ())),
                                preferred_element_type=jnp.float32) * scale
        p = jnp.exp(s - jnp.max(s, axis=-1, keepdims=True))
        p = p * pl.reciprocal(jnp.sum(p, axis=-1, keepdims=True), approx=True)
        ctxs.append(jnp.dot(p.astype(jnp.bfloat16), vh,
                            preferred_element_type=jnp.float32))        # [S,dh]
    ctx = jnp.concatenate(ctxs, axis=-1)                                # [S, D]
    attn = jnp.dot(ctx.astype(jnp.bfloat16), wo_ref[...],
                   preferred_element_type=jnp.float32) + bo_ref[...]

    h1 = _layer_norm(h + attn, ln1g_ref[...], ln1b_ref[...])
    ff = _gelu(jnp.dot(h1.astype(jnp.bfloat16), w1_ref[...],
                       preferred_element_type=jnp.float32) + b1_ref[...])
    ff = jnp.dot(ff.astype(jnp.bfloat16), w2_ref[...],
                 preferred_element_type=jnp.float32) + b2_ref[...]
    out = _layer_norm(h1 + ff, ln2g_ref[...], ln2b_ref[...])

    h_acc[...] = out                                     # stays in VMEM

    @pl.when(layer == pl.num_programs(1) - 1)
    def _():
        # x.mean(dim=1) of the original [B, S, D] hidden state.
        pooled_ref[...] = jnp.mean(out, axis=0, keepdims=True)


def encoder_stack(h0, stacked, *, n_head):
    B, S, D = h0.shape
    n_layers = stacked['w_qkv'].shape[0]
    weights = [stacked[name] for name in _W_ORDER]

    def wspec(arr):
        # [L, r, c] -> per-layer [r, c] tile, streamed along the layer axis.
        return pl.BlockSpec((None,) + arr.shape[1:], lambda b, l: (l, 0, 0))

    pooled = pl.pallas_call(
        functools.partial(encoder_stack_kernel, n_head=n_head),
        out_shape=jax.ShapeDtypeStruct((B, 1, D), jnp.float32),
        grid=(B, n_layers),
        in_specs=[pl.BlockSpec((None, S, D), lambda b, l: (b, 0, 0))]
                 + [wspec(w) for w in weights],
        out_specs=pl.BlockSpec((None, 1, D), lambda b, l: (b, 0, 0)),
        scratch_shapes=[pltpu.VMEM((S, D), jnp.float32)],
        compiler_params=pltpu.CompilerParams(
            dimension_semantics=("parallel", "arbitrary"),
            vmem_limit_bytes=32 * 1024 * 1024),
    )(h0, *weights)
    return pooled[:, 0, :]                               # [B, D] f32


# ----------------------------------------------------------------------------
# Kernel 2: RecurrentTrainer head, de-gridded (one block for the whole batch)
# ----------------------------------------------------------------------------
def head_kernel(pooled_ref, cos_ref, wlin_ref, blin_ref, wce_ref, bce_ref,
                wcos_ref, bcos_ref, wout_ref, bout_ref, o_ref, *, n_tau):
    B, D = pooled_ref.shape

    pooled = pooled_ref[...]                                            # [B, D]
    hlin = _gelu(jnp.dot(pooled, wlin_ref[...],
                         preferred_element_type=jnp.float32)
                 + blin_ref[...])                                       # [B, D]

    cosv = cos_ref[...]                                                 # [B*T,C]
    ce = _gelu(jnp.dot(cosv, wce_ref[...],
                       preferred_element_type=jnp.float32)
               + bce_ref[...])                                          # [B*T,D]

    y = hlin[:, None, :] * ce.reshape(B, n_tau, D)                      # [B,T,D]
    y = _gelu(jnp.dot(y.reshape(B * n_tau, D), wcos_ref[...],
                      preferred_element_type=jnp.float32)
              + bcos_ref[...])                                          # [B*T,D]

    out = jnp.sum(y.reshape(B, n_tau, D) * wout_ref[...][None], axis=-1)
    o_ref[...] = out + bout_ref[...]                                    # [B, T]


def head_call(pooled, cosvals, p):
    B, D = pooled.shape
    _, n_tau, n_cos = cosvals.shape
    cos2d = cosvals.reshape(B * n_tau, n_cos)
    return pl.pallas_call(
        functools.partial(head_kernel, n_tau=n_tau),
        out_shape=jax.ShapeDtypeStruct((B, n_tau), jnp.float32),
    )(pooled, cos2d, p['w_lin'], p['b_lin'], p['w_ce'], p['b_ce'],
      p['w_cos'], p['b_cos'], p['w_out'], p['b_out'])


# ----------------------------------------------------------------------------
# Parameter init (deterministic, synthetic) and forward wrapper
# ----------------------------------------------------------------------------
def init_params(key, vocab, n_layers, d_model, n_cos, seq_len):
    counter = [0]

    def nk():
        counter[0] += 1
        return jax.random.fold_in(key, counter[0])

    def lin(in_d, out_d, w_dtype=jnp.float32):
        # stored pre-transposed: W [in, out], b [1, out]
        w = (jax.random.normal(nk(), (in_d, out_d), jnp.float32) * 0.02).astype(w_dtype)
        b = jax.random.normal(nk(), (1, out_d), jnp.float32) * 0.02
        return w, b

    params = {
        'emb': jax.random.normal(nk(), (vocab, d_model), jnp.float32) * 0.02,
        'pos': jax.random.normal(nk(), (seq_len, d_model), jnp.float32) * 0.02,
    }

    # per-layer encoder weights, stacked on a leading layer axis;
    # matmul weights bf16 (MXU-native), biases / LN params f32.
    layers = []
    for _ in range(n_layers):
        w_qkv, b_qkv = lin(d_model, 3 * d_model, jnp.bfloat16)
        w_o, b_o = lin(d_model, d_model, jnp.bfloat16)
        w_ff1, b_ff1 = lin(d_model, 4 * d_model, jnp.bfloat16)
        w_ff2, b_ff2 = lin(4 * d_model, d_model, jnp.bfloat16)
        layers.append(dict(
            w_qkv=w_qkv, b_qkv=b_qkv, w_o=w_o, b_o=b_o,
            ln1_g=jnp.ones((1, d_model), jnp.float32),
            ln1_b=jnp.zeros((1, d_model), jnp.float32),
            w_ff1=w_ff1, b_ff1=b_ff1, w_ff2=w_ff2, b_ff2=b_ff2,
            ln2_g=jnp.ones((1, d_model), jnp.float32),
            ln2_b=jnp.zeros((1, d_model), jnp.float32)))
    params['encoder'] = {name: jnp.stack([lyr[name] for lyr in layers], axis=0)
                         for name in _W_ORDER}

    # head (tiny, kept f32)
    params['w_lin'], params['b_lin'] = lin(d_model, d_model)   # self.linear
    params['w_ce'], params['b_ce'] = lin(n_cos, d_model)       # self.cos_embedding
    params['w_cos'], params['b_cos'] = lin(d_model, d_model)   # self.cos
    w_out, b_out = lin(d_model, 1)                             # self.out
    params['w_out'] = w_out.T                                  # [1, d_model]
    params['b_out'] = b_out                                    # [1, 1]
    return params


def recurrent_trainer_forward(params, x_tok, state1, state2, tau_key,
                              *, n_head, n_cos, n_tau=8):
    B, S = x_tok.shape

    # --- TrainerTransformer stand-in: embed + pos + recurrent states, then the
    #     fused Pallas encoder stack (returns the seq-mean-pooled activation).
    h = params['emb'][x_tok] + params['pos'][None, :, :] + state1 + state2
    pooled = encoder_stack(h.astype(jnp.bfloat16), params['encoder'],
                           n_head=n_head)                     # [B, D] f32

    # --- calc_cos: taus ~ U(0,1), cos(tau * pi * i), i = 1..n_cos (1-indexed,
    #     matching the PyTorch `range(1, n_cos + 1)`).
    taus = jax.random.uniform(tau_key, (B, n_tau, 1), jnp.float32)
    pis = jnp.pi * jnp.arange(1, n_cos + 1, dtype=jnp.float32).reshape(1, 1, n_cos)
    cosvals = jnp.cos(taus * pis)                             # [B, n_tau, n_cos]

    # --- head (single de-gridded Pallas kernel) ---
    out = head_call(pooled, cosvals, params)                  # [B, n_tau]
    return out, taus[:, :, 0]


# ----------------------------------------------------------------------------
if __name__ == "__main__":
    # small shapes: batch=2, seq=8, d_model=32, n_head=4, n_cos=16, n_layers=2
    B, S, D, NH, NC, NL, V, NT = 2, 8, 32, 4, 16, 2, 64, 8

    key = jax.random.PRNGKey(0)
    pkey, xkey, s1key, s2key, tkey = jax.random.split(key, 5)

    params = init_params(pkey, V, NL, D, NC, S)
    x_tok = jax.random.randint(xkey, (B, S), 0, V, dtype=jnp.int32)   # token ids
    state1 = jax.random.normal(s1key, (B, S, D), jnp.float32) * 0.1
    state2 = jax.random.normal(s2key, (B, S, D), jnp.float32) * 0.1

    out, taus = recurrent_trainer_forward(
        params, x_tok, state1, state2, tkey, n_head=NH, n_cos=NC, n_tau=NT)
    out, taus = jax.block_until_ready((out, taus))

    assert out.shape == (B, NT) and taus.shape == (B, NT)
    assert bool(jnp.all(jnp.isfinite(out))) and bool(jnp.all(jnp.isfinite(taus)))
    print("KERNEL_OK")
</pallas_src>

<mosaic_0001>
module attributes {stable_mosaic.version = 11 : i64} {
  func.func @encoder_stack_kernel(%arg0: i32, %arg1: i32, %arg2: memref<1x8x32xbf16, #tpu.memory_space<vmem>>, %arg3: memref<1x32x96xbf16, #tpu.memory_space<vmem>>, %arg4: memref<1x1x96xf32, #tpu.memory_space<vmem>>, %arg5: memref<1x32x32xbf16, #tpu.memory_space<vmem>>, %arg6: memref<1x1x32xf32, #tpu.memory_space<vmem>>, %arg7: memref<1x1x32xf32, #tpu.memory_space<vmem>>, %arg8: memref<1x1x32xf32, #tpu.memory_space<vmem>>, %arg9: memref<1x32x128xbf16, #tpu.memory_space<vmem>>, %arg10: memref<1x1x128xf32, #tpu.memory_space<vmem>>, %arg11: memref<1x128x32xbf16, #tpu.memory_space<vmem>>, %arg12: memref<1x1x32xf32, #tpu.memory_space<vmem>>, %arg13: memref<1x1x32xf32, #tpu.memory_space<vmem>>, %arg14: memref<1x1x32xf32, #tpu.memory_space<vmem>>, %arg15: memref<1x1x32xf32, #tpu.memory_space<vmem>>, %arg16: memref<8x32xf32, #tpu.memory_space<vmem>>) attributes {dimension_semantics = [#tpu.dimension_semantics<parallel>, #tpu.dimension_semantics<arbitrary>], iteration_bounds = array<i64: 2, 2>, scalar_prefetch = 0 : i64, scratch_operands = 1 : i64, tpu.core_type = #tpu.core_type<tc>, window_params = [{transform_indices = @transform_0, window_bounds = array<i64: 1, 8, 32>}, {transform_indices = @transform_1, window_bounds = array<i64: 1, 32, 96>}, {transform_indices = @transform_2, window_bounds = array<i64: 1, 1, 96>}, {transform_indices = @transform_3, window_bounds = array<i64: 1, 32, 32>}, {transform_indices = @transform_4, window_bounds = array<i64: 1, 1, 32>}, {transform_indices = @transform_5, window_bounds = array<i64: 1, 1, 32>}, {transform_indices = @transform_6, window_bounds = array<i64: 1, 1, 32>}, {transform_indices = @transform_7, window_bounds = array<i64: 1, 32, 128>}, {transform_indices = @transform_8, window_bounds = array<i64: 1, 1, 128>}, {transform_indices = @transform_9, window_bounds = array<i64: 1, 128, 32>}, {transform_indices = @transform_10, window_bounds = array<i64: 1, 1, 32>}, {transform_indices = @transform_11, window_bounds = array<i64: 1, 1, 32>}, {transform_indices = @transform_12, window_bounds = array<i64: 1, 1, 32>}, {transform_indices = @transform_13, window_bounds = array<i64: 1, 1, 32>}]} {
    %c0_i32 = arith.constant 0 : i32
    %0 = arith.cmpi eq, %arg1, %c0_i32 : i32
    %1 = arith.extui %0 : i1 to i32
    %c0_i32_0 = arith.constant 0 : i32
    %2 = arith.cmpi ne, %1, %c0_i32_0 : i32
    scf.if %2 {
      %c0_78 = arith.constant 0 : index
      %c0_79 = arith.constant 0 : index
      %c0_80 = arith.constant 0 : index
      %195 = vector.load %arg2[%c0_78, %c0_79, %c0_80] : memref<1x8x32xbf16, #tpu.memory_space<vmem>>, vector<1x8x32xbf16>
      %196 = vector.shape_cast %195 : vector<1x8x32xbf16> to vector<8x32xbf16>
      %197 = arith.extf %196 : vector<8x32xbf16> to vector<8x32xf32>
      %c0_81 = arith.constant 0 : index
      %c0_82 = arith.constant 0 : index
      %198 = vector.load %arg16[%c0_81, %c0_82] : memref<8x32xf32, #tpu.memory_space<vmem>>, vector<8x32xf32>
      tpu.vector_store %arg16[%c0_81, %c0_82], %197 {strides = array<i32>} : memref<8x32xf32, #tpu.memory_space<vmem>>, vector<8x32xf32>,
    } else {
    }
    %c0 = arith.constant 0 : index
    %c0_1 = arith.constant 0 : index
    %3 = vector.load %arg16[%c0, %c0_1] : memref<8x32xf32, #tpu.memory_space<vmem>>, vector<8x32xf32>
    %4 = arith.truncf %3 : vector<8x32xf32> to vector<8x32xbf16>
    %c0_2 = arith.constant 0 : index
    %c0_3 = arith.constant 0 : index
    %c0_4 = arith.constant 0 : index
    %5 = vector.load %arg3[%c0_2, %c0_3, %c0_4] : memref<1x32x96xbf16, #tpu.memory_space<vmem>>, vector<1x32x96xbf16>
    %6 = vector.shape_cast %5 : vector<1x32x96xbf16> to vector<32x96xbf16>
    %cst = arith.constant dense<0.000000e+00> : vector<8x96xf32>
    %7 = tpu.matmul %4, %6, %cst {dimension_numbers = #tpu.dot_dimension_numbers<[1], [0], [0], [1], [0, 0, 1, 1], [], []>} : vector<8x32xbf16>, vector<32x96xbf16>, vector<8x96xf32> -> vector<8x96xf32>
    %c0_5 = arith.constant 0 : index
    %c0_6 = arith.constant 0 : index
    %c0_7 = arith.constant 0 : index
    %8 = vector.load %arg4[%c0_5, %c0_6, %c0_7] : memref<1x1x96xf32, #tpu.memory_space<vmem>>, vector<1x1x96xf32>
    %9 = vector.shape_cast %8 : vector<1x1x96xf32> to vector<1x96xf32>
    %10 = vector.broadcast %9 : vector<1x96xf32> to vector<8x96xf32>
    %11 = arith.addf %7, %10 : vector<8x96xf32>
    %12 = vector.extract_strided_slice %11 {offsets = [0, 0], sizes = [8, 32], strides = [1, 1]} : vector<8x96xf32> to vector<8x32xf32>
    %13 = vector.extract_strided_slice %11 {offsets = [0, 32], sizes = [8, 32], strides = [1, 1]} : vector<8x96xf32> to vector<8x32xf32>
    %14 = vector.extract_strided_slice %11 {offsets = [0, 64], sizes = [8, 32], strides = [1, 1]} : vector<8x96xf32> to vector<8x32xf32>
    %15 = vector.extract_strided_slice %12 {offsets = [0, 0], sizes = [8, 8], strides = [1, 1]} : vector<8x32xf32> to vector<8x8xf32>
    %16 = arith.truncf %15 : vector<8x8xf32> to vector<8x8xbf16>
    %17 = vector.extract_strided_slice %13 {offsets = [0, 0], sizes = [8, 8], strides = [1, 1]} : vector<8x32xf32> to vector<8x8xf32>
    %18 = arith.truncf %17 : vector<8x8xf32> to vector<8x8xbf16>
    %19 = vector.extract_strided_slice %14 {offsets = [0, 0], sizes = [8, 8], strides = [1, 1]} : vector<8x32xf32> to vector<8x8xf32>
    %20 = arith.truncf %19 : vector<8x8xf32> to vector<8x8xbf16>
    %cst_8 = arith.constant dense<0.000000e+00> : vector<8x8xf32>
    %21 = tpu.matmul %16, %18, %cst_8 {dimension_numbers = #tpu.dot_dimension_numbers<[1], [1], [0], [0], [0, 0, 1, 0], [], []>} : vector<8x8xbf16>, vector<8x8xbf16>, vector<8x8xf32> -> vector<8x8xf32>
    %cst_9 = arith.constant 0.353553385 : f32
    %22 = vector.broadcast %cst_9 : f32 to vector<8x8xf32>
    %23 = arith.mulf %21, %22 : vector<8x8xf32>
    %cst_10 = arith.constant dense<0xFF800000> : vector<8xf32>
    %24 = vector.multi_reduction <maximumf>, %23, %cst_10 [1] : vector<8x8xf32> to vector<8xf32>
    %25 = vector.shape_cast %24 : vector<8xf32> to vector<8x1xf32>
    %26 = vector.broadcast %25 : vector<8x1xf32> to vector<8x8xf32>
    %27 = arith.subf %23, %26 : vector<8x8xf32>
    %28 = math.exp %27 : vector<8x8xf32>
    %cst_11 = arith.constant dense<0.000000e+00> : vector<8xf32>
    %29 = vector.multi_reduction <add>, %28, %cst_11 [1] : vector<8x8xf32> to vector<8xf32>
    %30 = vector.shape_cast %29 : vector<8xf32> to vector<8x1xf32>
    %31 = tpu.reciprocal %30 {approx = true} : vector<8x1xf32> -> vector<8x1xf32>
    %32 = vector.broadcast %31 : vector<8x1xf32> to vector<8x8xf32>
    %33 = arith.mulf %28, %32 : vector<8x8xf32>
    %34 = arith.truncf %33 : vector<8x8xf32> to vector<8x8xbf16>
    %cst_12 = arith.constant dense<0.000000e+00> : vector<8x8xf32>
    %35 = tpu.matmul %34, %20, %cst_12 {dimension_numbers = #tpu.dot_dimension_numbers<[1], [0], [0], [1], [0, 0, 1, 1], [], []>} : vector<8x8xbf16>, vector<8x8xbf16>, vector<8x8xf32> -> vector<8x8xf32>
    %36 = vector.extract_strided_slice %12 {offsets = [0, 8], sizes = [8, 8], strides = [1, 1]} : vector<8x32xf32> to vector<8x8xf32>
    %37 = arith.truncf %36 : vector<8x8xf32> to vector<8x8xbf16>
    %38 = vector.extract_strided_slice %13 {offsets = [0, 8], sizes = [8, 8], strides = [1, 1]} : vector<8x32xf32> to vector<8x8xf32>
    %39 = arith.truncf %38 : vector<8x8xf32> to vector<8x8xbf16>
    %40 = vector.extract_strided_slice %14 {offsets = [0, 8], sizes = [8, 8], strides = [1, 1]} : vector<8x32xf32> to vector<8x8xf32>
    %41 = arith.truncf %40 : vector<8x8xf32> to vector<8x8xbf16>
    %cst_13 = arith.constant dense<0.000000e+00> : vector<8x8xf32>
    %42 = tpu.matmul %37, %39, %cst_13 {dimension_numbers = #tpu.dot_dimension_numbers<[1], [1], [0], [0], [0, 0, 1, 0], [], []>} : vector<8x8xbf16>, vector<8x8xbf16>, vector<8x8xf32> -> vector<8x8xf32>
    %cst_14 = arith.constant 0.353553385 : f32
    %43 = vector.broadcast %cst_14 : f32 to vector<8x8xf32>
    %44 = arith.mulf %42, %43 : vector<8x8xf32>
    %cst_15 = arith.constant dense<0xFF800000> : vector<8xf32>
    %45 = vector.multi_reduction <maximumf>, %44, %cst_15 [1] : vector<8x8xf32> to vector<8xf32>
    %46 = vector.shape_cast %45 : vector<8xf32> to vector<8x1xf32>
    %47 = vector.broadcast %46 : vector<8x1xf32> to vector<8x8xf32>
    %48 = arith.subf %44, %47 : vector<8x8xf32>
    %49 = math.exp %48 : vector<8x8xf32>
    %cst_16 = arith.constant dense<0.000000e+00> : vector<8xf32>
    %50 = vector.multi_reduction <add>, %49, %cst_16 [1] : vector<8x8xf32> to vector<8xf32>
    %51 = vector.shape_cast %50 : vector<8xf32> to vector<8x1xf32>
    %52 = tpu.reciprocal %51 {approx = true} : vector<8x1xf32> -> vector<8x1xf32>
    %53 = vector.broadcast %52 : vector<8x1xf32> to vector<8x8xf32>
    %54 = arith.mulf %49, %53 : vector<8x8xf32>
    %55 = arith.truncf %54 : vector<8x8xf32> to vector<8x8xbf16>
    %cst_17 = arith.constant dense<0.000000e+00> : vector<8x8xf32>
    %56 = tpu.matmul %55, %41, %cst_17 {dimension_numbers = #tpu.dot_dimension_numbers<[1], [0], [0], [1], [0, 0, 1, 1], [], []>} : vector<8x8xbf16>, vector<8x8xbf16>, vector<8x8xf32> -> vector<8x8xf32>
    %57 = vector.extract_strided_slice %12 {offsets = [0, 16], sizes = [8, 8], strides = [1, 1]} : vector<8x32xf32> to vector<8x8xf32>
    %58 = arith.truncf %57 : vector<8x8xf32> to vector<8x8xbf16>
    %59 = vector.extract_strided_slice %13 {offsets = [0, 16], sizes = [8, 8], strides = [1, 1]} : vector<8x32xf32> to vector<8x8xf32>
    %60 = arith.truncf %59 : vector<8x8xf32> to vector<8x8xbf16>
    %61 = vector.extract_strided_slice %14 {offsets = [0, 16], sizes = [8, 8], strides = [1, 1]} : vector<8x32xf32> to vector<8x8xf32>
    %62 = arith.truncf %61 : vector<8x8xf32> to vector<8x8xbf16>
    %cst_18 = arith.constant dense<0.000000e+00> : vector<8x8xf32>
    %63 = tpu.matmul %58, %60, %cst_18 {dimension_numbers = #tpu.dot_dimension_numbers<[1], [1], [0], [0], [0, 0, 1, 0], [], []>} : vector<8x8xbf16>, vector<8x8xbf16>, vector<8x8xf32> -> vector<8x8xf32>
    %cst_19 = arith.constant 0.353553385 : f32
    %64 = vector.broadcast %cst_19 : f32 to vector<8x8xf32>
    %65 = arith.mulf %63, %64 : vector<8x8xf32>
    %cst_20 = arith.constant dense<0xFF800000> : vector<8xf32>
    %66 = vector.multi_reduction <maximumf>, %65, %cst_20 [1] : vector<8x8xf32> to vector<8xf32>
    %67 = vector.shape_cast %66 : vector<8xf32> to vector<8x1xf32>
    %68 = vector.broadcast %67 : vector<8x1xf32> to vector<8x8xf32>
    %69 = arith.subf %65, %68 : vector<8x8xf32>
    %70 = math.exp %69 : vector<8x8xf32>
    %cst_21 = arith.constant dense<0.000000e+00> : vector<8xf32>
    %71 = vector.multi_reduction <add>, %70, %cst_21 [1] : vector<8x8xf32> to vector<8xf32>
    %72 = vector.shape_cast %71 : vector<8xf32> to vector<8x1xf32>
    %73 = tpu.reciprocal %72 {approx = true} : vector<8x1xf32> -> vector<8x1xf32>
    %74 = vector.broadcast %73 : vector<8x1xf32> to vector<8x8xf32>
    %75 = arith.mulf %70, %74 : vector<8x8xf32>
    %76 = arith.truncf %75 : vector<8x8xf32> to vector<8x8xbf16>
    %cst_22 = arith.constant dense<0.000000e+00> : vector<8x8xf32>
    %77 = tpu.matmul %76, %62, %cst_22 {dimension_numbers = #tpu.dot_dimension_numbers<[1], [0], [0], [1], [0, 0, 1, 1], [], []>} : vector<8x8xbf16>, vector<8x8xbf16>, vector<8x8xf32> -> vector<8x8xf32>
    %78 = vector.extract_strided_slice %12 {offsets = [0, 24], sizes = [8, 8], strides = [1, 1]} : vector<8x32xf32> to vector<8x8xf32>
    %79 = arith.truncf %78 : vector<8x8xf32> to vector<8x8xbf16>
    %80 = vector.extract_strided_slice %13 {offsets = [0, 24], sizes = [8, 8], strides = [1, 1]} : vector<8x32xf32> to vector<8x8xf32>
    %81 = arith.truncf %80 : vector<8x8xf32> to vector<8x8xbf16>
    %82 = vector.extract_strided_slice %14 {offsets = [0, 24], sizes = [8, 8], strides = [1, 1]} : vector<8x32xf32> to vector<8x8xf32>
    %83 = arith.truncf %82 : vector<8x8xf32> to vector<8x8xbf16>
    %cst_23 = arith.constant dense<0.000000e+00> : vector<8x8xf32>
    %84 = tpu.matmul %79, %81, %cst_23 {dimension_numbers = #tpu.dot_dimension_numbers<[1], [1], [0], [0], [0, 0, 1, 0], [], []>} : vector<8x8xbf16>, vector<8x8xbf16>, vector<8x8xf32> -> vector<8x8xf32>
    %cst_24 = arith.constant 0.353553385 : f32
    %85 = vector.broadcast %cst_24 : f32 to vector<8x8xf32>
    %86 = arith.mulf %84, %85 : vector<8x8xf32>
    %cst_25 = arith.constant dense<0xFF800000> : vector<8xf32>
    %87 = vector.multi_reduction <maximumf>, %86, %cst_25 [1] : vector<8x8xf32> to vector<8xf32>
    %88 = vector.shape_cast %87 : vector<8xf32> to vector<8x1xf32>
    %89 = vector.broadcast %88 : vector<8x1xf32> to vector<8x8xf32>
    %90 = arith.subf %86, %89 : vector<8x8xf32>
    %91 = math.exp %90 : vector<8x8xf32>
    %cst_26 = arith.constant dense<0.000000e+00> : vector<8xf32>
    %92 = vector.multi_reduction <add>, %91, %cst_26 [1] : vector<8x8xf32> to vector<8xf32>
    %93 = vector.shape_cast %92 : vector<8xf32> to vector<8x1xf32>
    %94 = tpu.reciprocal %93 {approx = true} : vector<8x1xf32> -> vector<8x1xf32>
    %95 = vector.broadcast %94 : vector<8x1xf32> to vector<8x8xf32>
    %96 = arith.mulf %91, %95 : vector<8x8xf32>
    %97 = arith.truncf %96 : vector<8x8xf32> to vector<8x8xbf16>
    %cst_27 = arith.constant dense<0.000000e+00> : vector<8x8xf32>
    %98 = tpu.matmul %97, %83, %cst_27 {dimension_numbers = #tpu.dot_dimension_numbers<[1], [0], [0], [1], [0, 0, 1, 1], [], []>} : vector<8x8xbf16>, vector<8x8xbf16>, vector<8x8xf32> -> vector<8x8xf32>
    %99 = tpu.concatenate %35, %56, %77, %98 in 1 : vector<8x8xf32>, vector<8x8xf32>, vector<8x8xf32>, vector<8x8xf32> -> vector<8x32xf32>
    %100 = arith.truncf %99 : vector<8x32xf32> to vector<8x32xbf16>
    %c0_28 = arith.constant 0 : index
    %c0_29 = arith.constant 0 : index
    %c0_30 = arith.constant 0 : index
    %101 = vector.load %arg5[%c0_28, %c0_29, %c0_30] : memref<1x32x32xbf16, #tpu.memory_space<vmem>>, vector<1x32x32xbf16>
    %102 = vector.shape_cast %101 : vector<1x32x32xbf16> to vector<32x32xbf16>
    %cst_31 = arith.constant dense<0.000000e+00> : vector<8x32xf32>
    %103 = tpu.matmul %100, %102, %cst_31 {dimension_numbers = #tpu.dot_dimension_numbers<[1], [0], [0], [1], [0, 0, 1, 1], [], []>} : vector<8x32xbf16>, vector<32x32xbf16>, vector<8x32xf32> -> vector<8x32xf32>
    %c0_32 = arith.constant 0 : index
    %c0_33 = arith.constant 0 : index
    %c0_34 = arith.constant 0 : index
    %104 = vector.load %arg6[%c0_32, %c0_33, %c0_34] : memref<1x1x32xf32, #tpu.memory_space<vmem>>, vector<1x1x32xf32>
    %105 = vector.shape_cast %104 : vector<1x1x32xf32> to vector<1x32xf32>
    %106 = vector.broadcast %105 : vector<1x32xf32> to vector<8x32xf32>
    %107 = arith.addf %103, %106 : vector<8x32xf32>
    %108 = arith.addf %3, %107 : vector<8x32xf32>
    %c0_35 = arith.constant 0 : index
    %c0_36 = arith.constant 0 : index
    %c0_37 = arith.constant 0 : index
    %109 = vector.load %arg7[%c0_35, %c0_36, %c0_37] : memref<1x1x32xf32, #tpu.memory_space<vmem>>, vector<1x1x32xf32>
    %110 = vector.shape_cast %109 : vector<1x1x32xf32> to vector<1x32xf32>
    %c0_38 = arith.constant 0 : index
    %c0_39 = arith.constant 0 : index
    %c0_40 = arith.constant 0 : index
    %111 = vector.load %arg8[%c0_38, %c0_39, %c0_40] : memref<1x1x32xf32, #tpu.memory_space<vmem>>, vector<1x1x32xf32>
    %112 = vector.shape_cast %111 : vector<1x1x32xf32> to vector<1x32xf32>
    %cst_41 = arith.constant dense<0.000000e+00> : vector<8xf32>
    %113 = vector.multi_reduction <add>, %108, %cst_41 [1] : vector<8x32xf32> to vector<8xf32>
    %114 = vector.shape_cast %113 : vector<8xf32> to vector<8x1xf32>
    %cst_42 = arith.constant 3.200000e+01 : f32
    %115 = vector.broadcast %cst_42 : f32 to vector<8x1xf32>
    %116 = arith.divf %114, %115 : vector<8x1xf32>
    %117 = vector.broadcast %116 : vector<8x1xf32> to vector<8x32xf32>
    %118 = arith.subf %108, %117 : vector<8x32xf32>
    %119 = arith.mulf %118, %118 : vector<8x32xf32>
    %cst_43 = arith.constant dense<0.000000e+00> : vector<8xf32>
    %120 = vector.multi_reduction <add>, %119, %cst_43 [1] : vector<8x32xf32> to vector<8xf32>
    %121 = vector.shape_cast %120 : vector<8xf32> to vector<8x1xf32>
    %cst_44 = arith.constant 3.200000e+01 : f32
    %122 = vector.broadcast %cst_44 : f32 to vector<8x1xf32>
    %123 = arith.divf %121, %122 : vector<8x1xf32>
    %124 = vector.broadcast %116 : vector<8x1xf32> to vector<8x32xf32>
    %125 = arith.subf %108, %124 : vector<8x32xf32>
    %cst_45 = arith.constant 9.99999974E-6 : f32
    %126 = vector.broadcast %cst_45 : f32 to vector<8x1xf32>
    %127 = arith.addf %123, %126 : vector<8x1xf32>
    %128 = math.rsqrt %127 : vector<8x1xf32>
    %129 = vector.broadcast %128 : vector<8x1xf32> to vector<8x32xf32>
    %130 = arith.mulf %125, %129 : vector<8x32xf32>
    %131 = vector.broadcast %110 : vector<1x32xf32> to vector<8x32xf32>
    %132 = arith.mulf %130, %131 : vector<8x32xf32>
    %133 = vector.broadcast %112 : vector<1x32xf32> to vector<8x32xf32>
    %134 = arith.addf %132, %133 : vector<8x32xf32>
    %135 = arith.truncf %134 : vector<8x32xf32> to vector<8x32xbf16>
    %c0_46 = arith.constant 0 : index
    %c0_47 = arith.constant 0 : index
    %c0_48 = arith.constant 0 : index
    %136 = vector.load %arg9[%c0_46, %c0_47, %c0_48] : memref<1x32x128xbf16, #tpu.memory_space<vmem>>, vector<1x32x128xbf16>
    %137 = vector.shape_cast %136 : vector<1x32x128xbf16> to vector<32x128xbf16>
    %cst_49 = arith.constant dense<0.000000e+00> : vector<8x128xf32>
    %138 = tpu.matmul %135, %137, %cst_49 {dimension_numbers = #tpu.dot_dimension_numbers<[1], [0], [0], [1], [0, 0, 1, 1], [], []>} : vector<8x32xbf16>, vector<32x128xbf16>, vector<8x128xf32> -> vector<8x128xf32>
    %c0_50 = arith.constant 0 : index
    %c0_51 = arith.constant 0 : index
    %c0_52 = arith.constant 0 : index
    %139 = vector.load %arg10[%c0_50, %c0_51, %c0_52] : memref<1x1x128xf32, #tpu.memory_space<vmem>>, vector<1x1x128xf32>
    %140 = vector.shape_cast %139 : vector<1x1x128xf32> to vector<1x128xf32>
    %141 = vector.broadcast %140 : vector<1x128xf32> to vector<8x128xf32>
    %142 = arith.addf %138, %141 : vector<8x128xf32>
    %cst_53 = arith.constant 5.000000e-01 : f32
    %143 = vector.broadcast %cst_53 : f32 to vector<8x128xf32>
    %144 = arith.mulf %143, %142 : vector<8x128xf32>
    %cst_54 = arith.constant 4.471500e-02 : f32
    %145 = vector.broadcast %cst_54 : f32 to vector<8x128xf32>
    %146 = arith.mulf %145, %142 : vector<8x128xf32>
    %147 = arith.mulf %146, %142 : vector<8x128xf32>
    %148 = arith.mulf %147, %142 : vector<8x128xf32>
    %149 = arith.addf %142, %148 : vector<8x128xf32>
    %cst_55 = arith.constant 0.797884583 : f32
    %150 = vector.broadcast %cst_55 : f32 to vector<8x128xf32>
    %151 = arith.mulf %150, %149 : vector<8x128xf32>
    %152 = math.tanh %151 : vector<8x128xf32>
    %cst_56 = arith.constant 1.000000e+00 : f32
    %153 = vector.broadcast %cst_56 : f32 to vector<8x128xf32>
    %154 = arith.addf %153, %152 : vector<8x128xf32>
    %155 = arith.mulf %144, %154 : vector<8x128xf32>
    %156 = arith.truncf %155 : vector<8x128xf32> to vector<8x128xbf16>
    %c0_57 = arith.constant 0 : index
    %c0_58 = arith.constant 0 : index
    %c0_59 = arith.constant 0 : index
    %157 = vector.load %arg11[%c0_57, %c0_58, %c0_59] : memref<1x128x32xbf16, #tpu.memory_space<vmem>>, vector<1x128x32xbf16>
    %158 = vector.shape_cast %157 : vector<1x128x32xbf16> to vector<128x32xbf16>
    %cst_60 = arith.constant dense<0.000000e+00> : vector<8x32xf32>
    %159 = tpu.matmul %156, %158, %cst_60 {dimension_numbers = #tpu.dot_dimension_numbers<[1], [0], [0], [1], [0, 0, 1, 1], [], []>} : vector<8x128xbf16>, vector<128x32xbf16>, vector<8x32xf32> -> vector<8x32xf32>
    %c0_61 = arith.constant 0 : index
    %c0_62 = arith.constant 0 : index
    %c0_63 = arith.constant 0 : index
    %160 = vector.load %arg12[%c0_61, %c0_62, %c0_63] : memref<1x1x32xf32, #tpu.memory_space<vmem>>, vector<1x1x32xf32>
    %161 = vector.shape_cast %160 : vector<1x1x32xf32> to vector<1x32xf32>
    %162 = vector.broadcast %161 : vector<1x32xf32> to vector<8x32xf32>
    %163 = arith.addf %159, %162 : vector<8x32xf32>
    %164 = arith.addf %134, %163 : vector<8x32xf32>
    %c0_64 = arith.constant 0 : index
    %c0_65 = arith.constant 0 : index
    %c0_66 = arith.constant 0 : index
    %165 = vector.load %arg13[%c0_64, %c0_65, %c0_66] : memref<1x1x32xf32, #tpu.memory_space<vmem>>, vector<1x1x32xf32>
    %166 = vector.shape_cast %165 : vector<1x1x32xf32> to vector<1x32xf32>
    %c0_67 = arith.constant 0 : index
    %c0_68 = arith.constant 0 : index
    %c0_69 = arith.constant 0 : index
    %167 = vector.load %arg14[%c0_67, %c0_68, %c0_69] : memref<1x1x32xf32, #tpu.memory_space<vmem>>, vector<1x1x32xf32>
    %168 = vector.shape_cast %167 : vector<1x1x32xf32> to vector<1x32xf32>
    %cst_70 = arith.constant dense<0.000000e+00> : vector<8xf32>
    %169 = vector.multi_reduction <add>, %164, %cst_70 [1] : vector<8x32xf32> to vector<8xf32>
    %170 = vector.shape_cast %169 : vector<8xf32> to vector<8x1xf32>
    %cst_71 = arith.constant 3.200000e+01 : f32
    %171 = vector.broadcast %cst_71 : f32 to vector<8x1xf32>
    %172 = arith.divf %170, %171 : vector<8x1xf32>
    %173 = vector.broadcast %172 : vector<8x1xf32> to vector<8x32xf32>
    %174 = arith.subf %164, %173 : vector<8x32xf32>
    %175 = arith.mulf %174, %174 : vector<8x32xf32>
    %cst_72 = arith.constant dense<0.000000e+00> : vector<8xf32>
    %176 = vector.multi_reduction <add>, %175, %cst_72 [1] : vector<8x32xf32> to vector<8xf32>
    %177 = vector.shape_cast %176 : vector<8xf32> to vector<8x1xf32>
    %cst_73 = arith.constant 3.200000e+01 : f32
    %178 = vector.broadcast %cst_73 : f32 to vector<8x1xf32>
    %179 = arith.divf %177, %178 : vector<8x1xf32>
    %180 = vector.broadcast %172 : vector<8x1xf32> to vector<8x32xf32>
    %181 = arith.subf %164, %180 : vector<8x32xf32>
    %cst_74 = arith.constant 9.99999974E-6 : f32
    %182 = vector.broadcast %cst_74 : f32 to vector<8x1xf32>
    %183 = arith.addf %179, %182 : vector<8x1xf32>
    %184 = math.rsqrt %183 : vector<8x1xf32>
    %185 = vector.broadcast %184 : vector<8x1xf32> to vector<8x32xf32>
    %186 = arith.mulf %181, %185 : vector<8x32xf32>
    %187 = vector.broadcast %166 : vector<1x32xf32> to vector<8x32xf32>
    %188 = arith.mulf %186, %187 : vector<8x32xf32>
    %189 = vector.broadcast %168 : vector<1x32xf32> to vector<8x32xf32>
    %190 = arith.addf %188, %189 : vector<8x32xf32>
    %c0_75 = arith.constant 0 : index
    %c0_76 = arith.constant 0 : index
    %191 = vector.load %arg16[%c0_75, %c0_76] : memref<8x32xf32, #tpu.memory_space<vmem>>, vector<8x32xf32>
    tpu.vector_store %arg16[%c0_75, %c0_76], %190 {strides = array<i32>} : memref<8x32xf32, #tpu.memory_space<vmem>>, vector<8x32xf32>,
    %c1_i32 = arith.constant 1 : i32
    %192 = arith.cmpi eq, %arg1, %c1_i32 : i32
    %193 = arith.extui %192 : i1 to i32
    %c0_i32_77 = arith.constant 0 : i32
    %194 = arith.cmpi ne, %193, %c0_i32_77 : i32
    scf.if %194 {
      %cst_78 = arith.constant dense<0.000000e+00> : vector<32xf32>
      %195 = vector.multi_reduction <add>, %190, %cst_78 [0] : vector<8x32xf32> to vector<32xf32>
      %196 = vector.shape_cast %195 : vector<32xf32> to vector<1x32xf32>
      %cst_79 = arith.constant 8.000000e+00 : f32
      %197 = vector.broadcast %cst_79 : f32 to vector<1x32xf32>
      %198 = arith.divf %196, %197 : vector<1x32xf32>
      %c0_80 = arith.constant 0 : index
      %c0_81 = arith.constant 0 : index
      %c0_82 = arith.constant 0 : index
      %199 = vector.load %arg15[%c0_80, %c0_81, %c0_82] : memref<1x1x32xf32, #tpu.memory_space<vmem>>, vector<1x1x32xf32>
      %200 = vector.shape_cast %199 : vector<1x1x32xf32> to vector<1x32xf32>
      %201 = vector.shape_cast %198 : vector<1x32xf32> to vector<1x1x32xf32>
      tpu.vector_store %arg15[%c0_80, %c0_81, %c0_82], %201 {strides = array<i32>} : memref<1x1x32xf32, #tpu.memory_space<vmem>>, vector<1x1x32xf32>,
    } else {
    }
    return
  }
  func.func @transform_0(%arg0: i32, %arg1: i32) -> (i32, i32, i32) {
    %c0_i32 = arith.constant 0 : i32
    %c0_i32_0 = arith.constant 0 : i32
    %c0_i32_1 = arith.constant 0 : i32
    return %arg0, %c0_i32, %c0_i32_0 : i32, i32, i32
  }
  func.func @transform_1(%arg0: i32, %arg1: i32) -> (i32, i32, i32) {
    %c0_i32 = arith.constant 0 : i32
    %c0_i32_0 = arith.constant 0 : i32
    %c0_i32_1 = arith.constant 0 : i32
    return %arg1, %c0_i32, %c0_i32_0 : i32, i32, i32
  }
  func.func @transform_2(%arg0: i32, %arg1: i32) -> (i32, i32, i32) {
    %c0_i32 = arith.constant 0 : i32
    %c0_i32_0 = arith.constant 0 : i32
    %c0_i32_1 = arith.constant 0 : i32
    return %arg1, %c0_i32, %c0_i32_0 : i32, i32, i32
  }
  func.func @transform_3(%arg0: i32, %arg1: i32) -> (i32, i32, i32) {
    %c0_i32 = arith.constant 0 : i32
    %c0_i32_0 = arith.constant 0 : i32
    %c0_i32_1 = arith.constant 0 : i32
    return %arg1, %c0_i32, %c0_i32_0 : i32, i32, i32
  }
  func.func @transform_4(%arg0: i32, %arg1: i32) -> (i32, i32, i32) {
    %c0_i32 = arith.constant 0 : i32
    %c0_i32_0 = arith.constant 0 : i32
    %c0_i32_1 = arith.constant 0 : i32
    return %arg1, %c0_i32, %c0_i32_0 : i32, i32, i32
  }
  func.func @transform_5(%arg0: i32, %arg1: i32) -> (i32, i32, i32) {
    %c0_i32 = arith.constant 0 : i32
    %c0_i32_0 = arith.constant 0 : i32
    %c0_i32_1 = arith.constant 0 : i32
    return %arg1, %c0_i32, %c0_i32_0 : i32, i32, i32
  }
  func.func @transform_6(%arg0: i32, %arg1: i32) -> (i32, i32, i32) {
    %c0_i32 = arith.constant 0 : i32
    %c0_i32_0 = arith.constant 0 : i32
    %c0_i32_1 = arith.constant 0 : i32
    return %arg1, %c0_i32, %c0_i32_0 : i32, i32, i32
  }
  func.func @transform_7(%arg0: i32, %arg1: i32) -> (i32, i32, i32) {
    %c0_i32 = arith.constant 0 : i32
    %c0_i32_0 = arith.constant 0 : i32
    %c0_i32_1 = arith.constant 0 : i32
    return %arg1, %c0_i32, %c0_i32_0 : i32, i32, i32
  }
  func.func @transform_8(%arg0: i32, %arg1: i32) -> (i32, i32, i32) {
    %c0_i32 = arith.constant 0 : i32
    %c0_i32_0 = arith.constant 0 : i32
    %c0_i32_1 = arith.constant 0 : i32
    return %arg1, %c0_i32, %c0_i32_0 : i32, i32, i32
  }
  func.func @transform_9(%arg0: i32, %arg1: i32) -> (i32, i32, i32) {
    %c0_i32 = arith.constant 0 : i32
    %c0_i32_0 = arith.constant 0 : i32
    %c0_i32_1 = arith.constant 0 : i32
    return %arg1, %c0_i32, %c0_i32_0 : i32, i32, i32
  }
  func.func @transform_10(%arg0: i32, %arg1: i32) -> (i32, i32, i32) {
    %c0_i32 = arith.constant 0 : i32
    %c0_i32_0 = arith.constant 0 : i32
    %c0_i32_1 = arith.constant 0 : i32
    return %arg1, %c0_i32, %c0_i32_0 : i32, i32, i32
  }
  func.func @transform_11(%arg0: i32, %arg1: i32) -> (i32, i32, i32) {
    %c0_i32 = arith.constant 0 : i32
    %c0_i32_0 = arith.constant 0 : i32
    %c0_i32_1 = arith.constant 0 : i32
    return %arg1, %c0_i32, %c0_i32_0 : i32, i32, i32
  }
  func.func @transform_12(%arg0: i32, %arg1: i32) -> (i32, i32, i32) {
    %c0_i32 = arith.constant 0 : i32
    %c0_i32_0 = arith.constant 0 : i32
    %c0_i32_1 = arith.constant 0 : i32
    return %arg1, %c0_i32, %c0_i32_0 : i32, i32, i32
  }
  func.func @transform_13(%arg0: i32, %arg1: i32) -> (i32, i32, i32) {
    %c0_i32 = arith.constant 0 : i32
    %c0_i32_0 = arith.constant 0 : i32
    %c0_i32_1 = arith.constant 0 : i32
    return %arg0, %c0_i32, %c0_i32_0 : i32, i32, i32
  }
}

</mosaic_0001>

<bundles_post_ra>
// kernel: tpu_custom_call.1
= control target key start
LH: loop header
LB: loop body
LE: loop exit
PB: predicated region body
PF: predicated region fallthrough
CT: control target
= control target key end

     0   :  { %s2542_s0 = inlined_call_operand.vmem [shape: bf16[2,8,32], index: 0, kind: input, shape index: {}]   ;;  %s2543_s1 = inlined_call_operand.vmem [shape: bf16[2,32,96], index: 1, kind: input, shape index: {}]   ;;  %s2544_s2 = inlined_call_operand.vmem [shape: f32[2,1,96], index: 2, kind: input, shape index: {}]   ;;  %s2545_s3 = inlined_call_operand.vmem [shape: bf16[2,32,32], index: 3, kind: input, shape index: {}]   ;;  %s2546_s4 = inlined_call_operand.vmem [shape: f32[2,1,32], index: 4, kind: input, shape index: {}]   ;;  %s2547_s5 = inlined_call_operand.vmem [shape: f32[2,1,32], index: 5, kind: input, shape index: {}]   ;;  %s2548_s6 = inlined_call_operand.vmem [shape: f32[2,1,32], index: 6, kind: input, shape index: {}]   ;;  %s2549_s7 = inlined_call_operand.vmem [shape: bf16[2,32,128], index: 7, kind: input, shape index: {}]   ;;  %s2550_s8 = inlined_call_operand.vmem [shape: f32[2,1,128], index: 8, kind: input, shape index: {}]   ;;  %s2551_s9 = inlined_call_operand.vmem [shape: bf16[2,128,32], index: 9, kind: input, shape index: {}]   ;;  %s2552_s10 = inlined_call_operand.vmem [shape: f32[2,1,32], index: 10, kind: input, shape index: {}]   ;;  %s2553_s11 = inlined_call_operand.vmem [shape: f32[2,1,32], index: 11, kind: input, shape index: {}]   ;;  %s2554_s12 = inlined_call_operand.vmem [shape: f32[2,1,32], index: 12, kind: input, shape index: {}]   ;;  %s2555_s13 = inlined_call_operand.hbm [shape: f32[2,1,32], index: 13, kind: output, shape index: {}]  }
   0x1   :  { %2569 = sst [smem:[#allocation18_spill]] %s2542_s0 }
   0x2   :  { %2570 = sst [smem:[#allocation19_spill]] %s2543_s1 }
   0x3   :  { %2571 = sst [smem:[#allocation20_spill]] %s2545_s3 }
   0x4   :  { %2572 = sst [smem:[#allocation21_spill]] %s2549_s7 }
   0x5   :  { %2573 = sst [smem:[#allocation22_spill]] %s2554_s12 }
   0x6   :  { %2574 = sst [smem:[#allocation23_spill]] %s2555_s13 }
   0x7   :  { %18 = vsyncpa [#allocation4], 0 }
   0x8   :  { %20 = vsyncpa [#allocation4 + $0x1], 0  ;;  %s2199_s25 = smov 0   ;;  %s2201_s26 = smov 0  }
   0x9   :  { %s2203_s27 = smov 0   ;;  %s2205_s28 = smov 0  }
   0xa   :  { %s2207_s29 = smov 0   ;;  %s2209_s30 = smov 0  }
   0xb   :  { %s2211_s14 = smov 0   ;;  %s2213_s15 = smov 0  }
   0xc LB: > { %2575 = sst [smem:[#allocation6_spill]] %s2082_s25  ;;  %s1711_s16 = sadd.s32 4294967295, %s2110_s15   ;;  %s2110_s15 = sphi %s2213_s15, %s26_s15   ;;  %s2106_s14 = sphi %s2211_s14, %s2615_s14   ;;  %s2102_s30 = sphi %s2209_s30, %s2614_s30   ;;  %s2098_s29 = sphi %s2207_s29, %s2613_s29   ;;  %s2094_s28 = sphi %s2205_s28, %s2618_s28   ;;  %s2090_s27 = sphi %s2203_s27, %s2611_s27   ;;  %s2086_s26 = sphi %s2201_s26, %s2617_s26   ;;  %s2082_s25 = sphi %s2199_s25, %s2616_s25  }
   0xd   : > { %2576 = sst [smem:[#allocation7_spill]] %s2090_s27  ;;  %s1712_s17 = sadd.s32 4294967294, %s2110_s15  }
   0xe   : > { %2577 = sst [smem:[#allocation8_spill]] %s2094_s28  ;;  %s35_s18 = sadd.s32 1, %s2102_s30 }
   0xf   : > { %2578 = sst [smem:[#allocation9_spill]] %s2098_s29  ;;  %p36_p0 = scmp.ge.s32.totalorder %s35_s18, 2 }
  0x10   : > { %2579 = sst [smem:[#allocation10_spill]] %s2102_s30  ;;  %s38_s19 = sadd.s32 1, %s2106_s14 }
  0x11   : > { %2580 = sst [smem:[#allocation11_spill]] %s2106_s14  ;;  %p393_p1 = scmp.ne.s32.totalorder %s2090_s27, %s2086_s26 }
  0x12   : > { %2581 = sst [smem:[#allocation12_spill]] %s2110_s15  ;;  %p394_p2 = scmp.eq.s32.totalorder %s1711_s16, 3 }
  0x13   : > { %s2620_s18 = smov (%p36_p0, %s35_s18), 0  ;;  %s2622_s19 = smov (!%p36_p0, %s38_s19), %s2106_s14 }
  0x14   : > { %2582 = sst [smem:[#allocation13_spill]] %s2620_s18  ;;  %p2248_p3 = por %p394_p2, %p393_p1 }
  0x15   : > { %p399_p4 = scmp.ne.s32.totalorder %s2086_s26, %s2082_s25  ;;  %p40_p5 = scmp.ge.s32.totalorder %s2622_s19, 2 }
  0x16   : > { %s2583_s20 = scalar_select %p2248_p3, 1, 0 }
  0x17   : > { %p400_p6 = scmp.eq.s32.totalorder %s1712_s17, 3  ;;  %p1715_p7 = scmp.ge.s32.totalorder %s2110_s15, 1 }
  0x18   : > { %2584 = sst [smem:[#allocation14_spill]] %s2583_s20  ;;  %p505_p8 = scmp.lt.s32.totalorder %s2110_s15, 5 }
  0x19   : > { %s2624_s19 = smov (%p40_p5, %s2622_s19), 0  ;;  %p2258_p9 = por %p400_p6, %p399_p4 }
  0x1a   : > { %2585 = sst [smem:[#allocation15_spill]] %s2624_s19  ;;  %p506_p10 = pnand %p1715_p7, %p505_p8 }
  0x1b   : > { %s2586_s21 = scalar_select %p2258_p9, 1, 0 }
  0x1c   : > { %s380_s22 = ssub.s32 %s2106_s14, %s2624_s19  ;;  %s383_s23 = sadd.s32 1, %s2090_s27 }
  0x1d   : > { %2587 = sst [smem:[#allocation16_spill]] %s2586_s21  ;;  %p381_p11 = scmp.eq.s32.totalorder %s380_s22, 0 }
  0x1e   : > { %509 = sbr.rel (%p506_p10) target bundleno = 2664 (0xa68), region = 72  ;;  %p591_p12 = scmp.lt.s32.totalorder (!%p506_p10), %s2098_s29, 1 }
  0x1f   : > { %s2266_s24 = scalar_select %p381_p11, %s2090_s27, %s383_s23  }
  0x20   : > { %p595_p13 = scmp.lt.s32.totalorder (!%p506_p10), %s2094_s28, 1  ;;  %s2589_s0 = sld [smem:[#allocation18_spill]] (!%p506_p10) }
  0x21   : > { %2588 = sst [smem:[#allocation17_spill]] %s2266_s24  ;;  %s2590_s1 = sld [smem:[#allocation19_spill]] (!%p506_p10) }
  0x22   : > { %s2591_s3 = sld [smem:[#allocation20_spill]] (!%p506_p10)  ;;  %s2592_s7 = sld [smem:[#allocation21_spill]] (!%p506_p10) }
  0x23   : > { %s2593_s24 = sld [smem:[#allocation22_spill]] (!%p506_p10)  ;;  %s2594_s13 = sand.u32 (!%p506_p10), 1, %s2086_s26  }
  0x24   : > { %s2332_s20 = scalar_lea.vmem (!%p506_p10), [#allocation3], %s2594_s13  ;;  %s2595_s15 = sld [smem:[#allocation8_spill]] (!%p506_p10) }
  0x25   : > { %s592_s17 = scalar_select %p591_p12, %s2098_s29, 1 }
  0x26   : > { %s2273_s18 = scalar_select %p595_p13, %s2094_s28, 1 }
  0x27   : > { %s1716_s22 = sshll.u32 %s592_s17, 2 }
  0x28   : > { %s594_s16 = scalar_lea.vmem %s2589_s0, %s1716_s22  ;;  %s1763_s14 = sshll.u32 %s2273_s18, 4 }
  0x29   : > { %s599_s27 = scalar_lea.vmem %s2590_s1, %s1763_s14  ;;  %s2289_s29 = scalar_lea.vmem %s2591_s3, %s1763_s14 }
  0x2a   : > { %s2306_s21 = scalar_lea.vmem %s2592_s7, %s1763_s14  ;;  %s1766_s3 = sshll.u32 %s2273_s18, 6 }
  0x2b   : > { %s632_s19 = scalar_lea.vmem %s2552_s10, %s2273_s18  ;;  %s2320_s0 = scalar_lea.vmem %s2551_s9, %s1766_s3 }
  0x2c   : > { %s635_s1 = scalar_lea.vmem %s2553_s11, %s2273_s18  ;;  %s638_s7 = scalar_lea.vmem %s2593_s24, %s2273_s18 }
  0x2d   : > { %p1725_p0 = scmp.ne.s32.totalorder %s2595_s15, 0 }
  0x2e   : > { %v644_v0 = vld [vmem:[%s594_s16] sm:$0xf] (!%p1725_p0)  ;;  %vm646_vm0 = vcmask (!%p1725_p0), 261120  }
  0x2f   : > { %643 = sbr.rel (%p1725_p0) target bundleno = 54 (0x36), region = 76  ;;  %v645_v1 = vunpack.c.l.bf16 (!%p1725_p0), %v644_v0 }
  0x31   : > { %647 = vst.msk [vmem:[#allocation2] sm:$0xff] (!%p1725_p0), %vm646_vm0, %v645_v1 }
  0x36 PF: > { %v1980_v2 = vld [vmem:[%s599_s27] sm:$0xff]   ;;  %v2112_v3 = vmov 0.0   ;;  %v1981_v4 = vld [vmem:[%s599_s27 + $0x8] sm:$0xff]   ;;  %vm2113_vm1 = vmmov 0   ;;  %vm673_vm2 = vcmask 261120   ;;  %s2596_s15 = scalar_lea.vmem %s2544_s2, %s2273_s18  ;;  %s2114_s16 = smov 120  }
  0x37   : > { %1801 = vmatprep.subr.bf16.mxu0 %v2112_v3  ;;  %1821 = vmatprep.subr.bf16.mxu1 %v2112_v3  ;;  %v1726_v7 = vld [vmem:[%s2596_s15] ss:$0 sm:$0xff]  ;;  %s2115_s24 = smov 96   ;;  %s2116_s28 = smov 80   ;;  %vm721_vm3 = vcmask 64512   ;;  %vm786_vm4 = vcmask 1043456  }
  0x38   : > { %1802 = vmatpush3.bf16.msra.mxu0 %v1980_v2  ;;  %1805 = vmatprep.mubr.msk.bf16.mxu0 %vm2113_vm1, %v2112_v3  ;;  %v2339_v5 = vld [vmem:[#allocation2] sm:$0xff]  ;;  %s2117_s17 = smov 88   ;;  %s2118_s23 = smov 72   ;;  %vm1176_vm5 = vcmask 130048   ;;  %vm1178_vm6 = vcmask 195584  }
  0x39   : > { %1803 = vmatprep.subr.bf16.mxu0 %v2112_v3  ;;  %1823 = vmatprep.mubr.msk.bf16.mxu1 %vm2113_vm1, %v2112_v3  ;;  %v649_v6 = vpack.c.bf16 %v2339_v5, %v2339_v5  ;;  %s2119_s22 = smov 112   ;;  %s2120_s12 = smov 104  }
  0x3a   : > { %s2121_s30 = smov 56   ;;  %s2122_s14 = smov 64  }
  0x3b   : > { %s2123_s25 = smov 40   ;;  %s2124_s13 = smov 48  }
  0x3c   : > { %1804 = vmatpush3.bf16.msra.mxu0 %v1981_v4  ;;  %s2125_s3 = smov 8   ;;  %s2126_s27 = smov 16  }
  0x3d   : > { %1809 = vmatprep.subr.bf16.mxu0 %v2112_v3  ;;  %s2127_s15 = smov 24  }
  0x3f   : > { %1806 = vmatmul.mubr.msk.bf16.vlgmr.msra.gmra.mrb[0].mxu0 %vm673_vm2, %v649_v6 }
  0x40   : > { %1811 = vmatprep.mubr.msk.bf16.mxu0 %vm2113_vm1, %v2112_v3 }
 0x112   : > { %v711_v8 = vpop.f32.mrb[0].mxu0 }
 0x113   : > { %v712_v9 = vadd.f32 %v1726_v7, %v711_v8  ;;  %v1807_v10 = vpop.f32.mrb[1].mxu0 }
 0x114   : > { %v714_v11 = vpop.f32.mrb[2].mxu0 }
 0x115   : > { %v2355_v12 = vpack.c.bf16 %v712_v9, %v712_v9  ;;  %v1808_v13 = vpop.f32.mrb[3].mxu0 }
 0x117   : > { %830 = vrot.lane.b32.xlu1 %v2355_v12, %s2114_s16  ;;  %719 = vrot.lane.b32.xlu0 %v2355_v12, %s2115_s24  ;;  %s2597_s24 = scalar_lea.vmem %s2546_s4, %s2273_s18  ;;  %s2602_s16 = sld [smem:[#allocation8_spill]] }
 0x11b   : > { %943 = vrot.lane.b32.xlu1 %v2355_v12, %s2116_s28  ;;  %832 = vrot.lane.b32.xlu0 %v2355_v12, %s2117_s17 }
 0x11d   : > { %p1759_p1 = scmp.ne.s32.totalorder %s2602_s16, 1 }
 0x11e   : > { %vm1510_vm7 = vcmask (!%p1759_p1), 253952  }
 0x11f   : > { %1054 = vrot.lane.b32.xlu1 %v2355_v12, %s2118_s23  ;;  %941 = vrot.lane.b32.xlu0 %v2355_v12, %s2119_s22  ;;  %s2598_s23 = scalar_lea.vmem %s2547_s5, %s2273_s18 }
 0x123   : > { %1052 = vrot.lane.b32.xlu0 %v2355_v12, %s2120_s12  ;;  %s2599_s12 = scalar_lea.vmem %s2548_s6, %s2273_s18 }
 0x189   : > { %v720_v14 = vpop.permute.xlu0 %719  ;;  %v831_v16 = vpop.permute.xlu1 %830 }
 0x18a   : > { %v726_v15 = vsel %vm721_vm3, %v720_v14, 0 }
 0x18b   : > { %1810 = vmatpush3.bf16.xpose.msra.mxu0 %v726_v15 }
 0x18c   : > { %1815 = vmatprep.subr.bf16.mxu0 %v2112_v3 }
 0x18d   : > { %v833_v17 = vpop.permute.xlu0 %832  ;;  %v944_v19 = vpop.permute.xlu1 %943 }
 0x18e   : > { %v838_v18 = vsel %vm721_vm3, %v833_v17, 0  ;;  %v949_v20 = vsel %vm721_vm3, %v944_v19, 0 }
 0x18f   : > { %1822 = vmatpush3.bf16.xpose.msra.mxu1 %v838_v18 }
 0x190   : > { %1833 = vmatprep.subr.bf16.mxu1 %v2112_v3 }
 0x191   : > { %v1055_v21 = vpop.permute.xlu1 %1054  ;;  %v942_v22 = vpop.permute.xlu0 %941 }
 0x192   : > { %1812 = vmatmul.mubr.msk.bf16.vlgmr.msra.gmra.mrb[4].mxu0 %vm721_vm3, %v2355_v12  ;;  %v1060_v23 = vsel %vm721_vm3, %v1055_v21, 0 }
 0x193   : > { %1817 = vmatprep.mubr.msk.bf16.mxu0 %vm2113_vm1, %v2112_v3 }
 0x195   : > { %v1053_v24 = vpop.permute.xlu0 %1052 }
 0x196   : > { %1824 = vmatmul.mubr.msk.bf16.vlgmr.msra.gmra.mrb[0].mxu1 %vm721_vm3, %v831_v16 }
 0x197   : > { %1834 = vmatpush3.bf16.xpose.msra.mxu1 %v949_v20  ;;  %1835 = vmatprep.mubr.msk.bf16.mxu1 %vm2113_vm1, %v2112_v3 }
 0x198   : > { %1845 = vmatprep.subr.bf16.mxu1 %v2112_v3 }
 0x19e   : > { %1836 = vmatmul.mubr.msk.bf16.vlgmr.msra.gmra.mrb[4].mxu1 %vm721_vm3, %v942_v22 }
 0x19f   : > { %1846 = vmatpush3.bf16.xpose.msra.mxu1 %v1060_v23  ;;  %1847 = vmatprep.mubr.msk.bf16.mxu1 %vm2113_vm1, %v2112_v3 }
 0x1a0   : > { %1857 = vmatprep.subr.bf16.mxu1 %v2112_v3 }
 0x1a6   : > { %1848 = vmatmul.mubr.msk.bf16.vlgmr.msra.gmra.mrb[8].mxu1 %vm721_vm3, %v1053_v24 }
 0x1a7   : > { %1861 = vmatprep.mubr.msk.bf16.mxu1 %vm2113_vm1, %v2112_v3 }
 0x265   : > { %v762_v25 = vpop.f32.mrb[4].mxu0 }
 0x266   : > { %v768_v26 = vmul.f32 0.35355338, %v762_v25  ;;  %v1813_v27 = vpop.f32.mrb[5].mxu0 }
 0x267   : > { %v765_v28 = vpop.f32.mrb[6].mxu0 }
 0x268   : > { %v1814_v29 = vpop.f32.mrb[7].mxu0  ;;  %v769_v30 = vsel %vm721_vm3, %v768_v26, -inf }
 0x269   : > { %v874_v31 = vpop.f32.mrb[0].mxu1  ;;  %770 = vmax.xlane.f32.xlu1 %v769_v30 }
 0x26a   : > { %v880_v32 = vmul.f32 0.35355338, %v874_v31  ;;  %v1825_v33 = vpop.f32.mrb[1].mxu1 }
 0x26b   : > { %v877_v34 = vpop.f32.mrb[2].mxu1 }
 0x26c   : > { %v1826_v35 = vpop.f32.mrb[3].mxu1  ;;  %v881_v36 = vsel %vm721_vm3, %v880_v32, -inf }
 0x26d   : > { %882 = vmax.xlane.f32.xlu0 %v881_v36 }
 0x271   : > { %v985_v37 = vpop.f32.mrb[4].mxu1 }
 0x272   : > { %v991_v38 = vmul.f32 0.35355338, %v985_v37  ;;  %v1837_v39 = vpop.f32.mrb[5].mxu1 }
 0x273   : > { %v988_v40 = vpop.f32.mrb[6].mxu1  ;;  %v1982_v39 = vld [vmem:[%s2289_s29] sm:$0xff]  }
 0x274   : > { %v1838_v41 = vpop.f32.mrb[7].mxu1  ;;  %v992_v42 = vsel %vm721_vm3, %v991_v38, -inf  ;;  %1858 = vmatpush3.bf16.msra.mxu1 %v1982_v39  ;;  %v1983_v40 = vld [vmem:[%s2289_s29 + $0x8] sm:$0xff]  }
 0x275   : > { %993 = vmax.xlane.f32.xlu0 %v992_v42  ;;  %1859 = vmatprep.subr.bf16.mxu1 %v2112_v3 }
 0x278   : > { %1860 = vmatpush3.bf16.msra.mxu1 %v1983_v40 }
 0x279   : > { %v1096_v43 = vpop.f32.mrb[8].mxu1  ;;  %1873 = vmatprep.subr.bf16.mxu1 %v2112_v3 }
 0x27a   : > { %v1102_v44 = vmul.f32 0.35355338, %v1096_v43  ;;  %v1849_v45 = vpop.f32.mrb[9].mxu1 }
 0x27b   : > { %v1099_v46 = vpop.f32.mrb[10].mxu1 }
 0x27c   : > { %v1850_v47 = vpop.f32.mrb[11].mxu1  ;;  %v1103_v48 = vsel %vm721_vm3, %v1102_v44, -inf }
 0x27d   : > { %1104 = vmax.xlane.f32.xlu1 %v1103_v48 }
 0x2f6   : > { %v771_v49 = vpop.xlane.xlu1 %770 }
 0x2f7   : > { %v772_v50 = vsub.f32 %v768_v26, %v771_v49 }
 0x2f9   : > { %v773_v51 = vmul.f32 1.442695, %v772_v50 }
 0x2fa   : > { %v883_v52 = vpop.xlane.xlu0 %882 }
 0x2fb   : > { %1994 = vpow2.f32 %v773_v51  ;;  %v884_v53 = vsub.f32 %v880_v32, %v883_v52 }
 0x2fd   : > { %v885_v54 = vmul.f32 1.442695, %v884_v53 }
 0x2ff   : > { %1996 = vpow2.f32 %v885_v54 }
 0x302   : > { %v994_v55 = vpop.xlane.xlu0 %993 }
 0x303   : > { %v995_v56 = vsub.f32 %v991_v38, %v994_v55 }
 0x305   : > { %v1995_v57 = vpop.eup %1994  ;;  %v996_v58 = vmul.f32 1.442695, %v995_v56  ;;  %v1738_v56 = vld [vmem:[%s2597_s24] ss:$0 sm:$0xff] }
 0x306   : > { %v775_v59 = vsel %vm721_vm3, %v1995_v57, 0.0 }
 0x307   : > { %1998 = vpow2.f32 %v996_v58  ;;  %776 = vadd.xlane.f32.xlu0 %v775_v59 }
 0x309   : > { %v1997_v60 = vpop.eup %1996 }
 0x30a   : > { %v887_v61 = vsel %vm721_vm3, %v1997_v60, 0.0  ;;  %v1105_v0 = vpop.xlane.xlu1 %1104 }
 0x30b   : > { %888 = vadd.xlane.f32.xlu1 %v887_v61  ;;  %v1106_v1 = vsub.f32 %v1102_v44, %v1105_v0 }
 0x30d   : > { %v1107_v2 = vmul.f32 1.442695, %v1106_v1 }
 0x30f   : > { %2000 = vpow2.f32 %v1107_v2 }
 0x311   : > { %v1999_v62 = vpop.eup %1998 }
 0x312   : > { %v998_v63 = vsel %vm721_vm3, %v1999_v62, 0.0 }
 0x313   : > { %999 = vadd.xlane.f32.xlu0 %v998_v63 }
 0x319   : > { %v2001_v4 = vpop.eup %2000 }
 0x31a   : > { %v1109_v6 = vsel %vm721_vm3, %v2001_v4, 0.0 }
 0x31c   : > { %893 = vrot.lane.b32.xlu1 %v2355_v12, %s2121_s30 }
 0x329   : > { %781 = vrot.lane.b32.xlu0 %v2355_v12, %s2122_s14 }
 0x32d   : > { %1115 = vrot.lane.b32.xlu0 %v2355_v12, %s2123_s25  ;;  %s2600_s25 = scalar_lea.vmem %s2550_s8, %s2273_s18 }
 0x340   : > { %1110 = vadd.xlane.f32.xlu1 %v1109_v6 }
 0x351   : > { %1004 = vrot.lane.b32.xlu1 %v2355_v12, %s2124_s13 }
 0x394   : > { %v777_v7 = vpop.xlane.xlu0 %776 }
 0x395   : > { %2002 = vrcp.f32 %v777_v7  ;;  %v1984_v7 = vld [vmem:[%s2306_s21] sm:$0xff]  }
 0x398   : > { %v889_v8 = vpop.xlane.xlu1 %888 }
 0x399   : > { %2004 = vrcp.f32 %v889_v8  ;;  %v1985_v8 = vld [vmem:[%s2306_s21 + $0x8] sm:$0xff]  }
 0x39c   : > { %v894_v15 = vpop.permute.xlu1 %893 }
 0x39d   : > { %v899_v18 = vsel %vm786_vm4, %v894_v15, 0 }
 0x39f   : > { %v2003_v9 = vpop.eup %2002 }
 0x3a0   : > { %v1000_v10 = vpop.xlane.xlu0 %999  ;;  %v779_v11 = vmul.f32 %v2003_v9, %v1995_v57 }
 0x3a1   : > { %2006 = vrcp.f32 %v1000_v10 }
 0x3a2   : > { %v780_v16 = vpack.c.bf16 %v779_v11, %v779_v11 }
 0x3a3   : > { %v2005_v17 = vpop.eup %2004 }
 0x3a4   : > { %v782_v13 = vpop.permute.xlu0 %781  ;;  %v891_v12 = vmul.f32 %v2005_v17, %v1997_v60 }
 0x3a5   : > { %v788_v14 = vsel %vm786_vm4, %v782_v13, 0 }
 0x3a6   : > { %1816 = vmatpush3.bf16.msra.mxu0 %v788_v14  ;;  %v892_v19 = vpack.c.bf16 %v891_v12, %v891_v12  ;;  %v1742_v14 = vld [vmem:[%s2598_s23] ss:$0 sm:$0xff] }
 0x3a7   : > { %1827 = vmatprep.subr.bf16.mxu0 %v2112_v3 }
 0x3a8   : > { %v1116_v25 = vpop.permute.xlu0 %1115 }
 0x3a9   : > { %1818 = vmatmul.mubr.msk.bf16.vlgmr.msra.gmra.mrb[8].mxu0 %vm721_vm3, %v780_v16  ;;  %v1121_v27 = vsel %vm786_vm4, %v1116_v25, 0  ;;  %v1743_v16 = vld [vmem:[%s2599_s12] ss:$0 sm:$0xff]  ;;  %v1993_v25 = vld [vmem:[%s2320_s0 + $0x38] sm:$0xff]  }
 0x3aa   : > { %1828 = vmatpush3.bf16.msra.mxu0 %v899_v18  ;;  %1829 = vmatprep.mubr.msk.bf16.mxu0 %vm2113_vm1, %v2112_v3 }
 0x3ab   : > { %1839 = vmatprep.subr.bf16.mxu0 %v2112_v3  ;;  %v2007_v20 = vpop.eup %2006 }
 0x3ac   : > { %v1002_v22 = vmul.f32 %v2007_v20, %v1999_v62  ;;  %v1988_v20 = vld [vmem:[%s2320_s0 + $0x10] sm:$0xff]  }
 0x3ae   : > { %v1003_v26 = vpack.c.bf16 %v1002_v22, %v1002_v22  ;;  %v1990_v22 = vld [vmem:[%s2320_s0 + $0x20] sm:$0xff]  }
 0x3b1   : > { %1830 = vmatmul.mubr.msk.bf16.vlgmr.msra.gmra.mrb[12].mxu0 %vm721_vm3, %v892_v19  ;;  %v1987_v19 = vld [vmem:[%s2320_s0 + $0x8] sm:$0xff]  }
 0x3b2   : > { %1841 = vmatprep.mubr.msk.bf16.mxu0 %vm2113_vm1, %v2112_v3 }
 0x3cd   : > { %v1111_v21 = vpop.xlane.xlu1 %1110 }
 0x3ce   : > { %2008 = vrcp.f32 %v1111_v21  ;;  %v1989_v21 = vld [vmem:[%s2320_s0 + $0x18] sm:$0xff]  }
 0x3d1   : > { %v1005_v23 = vpop.permute.xlu1 %1004 }
 0x3d2   : > { %v1010_v24 = vsel %vm786_vm4, %v1005_v23, 0  ;;  %v1991_v23 = vld [vmem:[%s2320_s0 + $0x28] sm:$0xff]  }
 0x3d3   : > { %1840 = vmatpush3.bf16.msra.mxu0 %v1010_v24  ;;  %v1992_v24 = vld [vmem:[%s2320_s0 + $0x30] sm:$0xff]  }
 0x3d4   : > { %1851 = vmatprep.subr.bf16.mxu0 %v2112_v3 }
 0x3d6   : > { %1842 = vmatmul.mubr.msk.bf16.vlgmr.msra.gmra.mrb[16].mxu0 %vm721_vm3, %v1003_v26  ;;  %v1744_v26 = vld [vmem:[%s2600_s25] ss:$0 sm:$0xff] }
 0x3d7   : > { %1852 = vmatpush3.bf16.msra.mxu0 %v1121_v27  ;;  %1853 = vmatprep.mubr.msk.bf16.mxu0 %vm2113_vm1, %v2112_v3 }
 0x3d8   : > { %v2009_v28 = vpop.eup %2008  ;;  %1865 = vmatprep.subr.bf16.mxu0 %v2112_v3 }
 0x3d9   : > { %v1113_v29 = vmul.f32 %v2009_v28, %v2001_v4 }
 0x3db   : > { %v1114_v30 = vpack.c.bf16 %v1113_v29, %v1113_v29 }
 0x3de   : > { %1854 = vmatmul.mubr.msk.bf16.vlgmr.msra.gmra.mrb[20].mxu0 %vm721_vm3, %v1114_v30 }
 0x3df   : > { %1869 = vmatprep.mubr.msk.bf16.mxu0 %vm2113_vm1, %v2112_v3  ;;  %1866 = vmatpush3.bf16.msra.mxu0 %v1984_v7 }
 0x3e0   : > { %1867 = vmatprep.subr.bf16.mxu0 %v2112_v3 }
 0x3e3   : > { %1868 = vmatpush3.bf16.msra.mxu0 %v1985_v8 }
 0x47c   : > { %v824_v31 = vpop.f32.mrb[8].mxu0 }
 0x47d   : > { %v1819_v32 = vpop.f32.mrb[9].mxu0 }
 0x47e   : > { %v827_v33 = vpop.f32.mrb[10].mxu0 }
 0x47f   : > { %v1820_v34 = vpop.f32.mrb[11].mxu0 }
 0x484   : > { %v935_v35 = vpop.f32.mrb[12].mxu0 }
 0x485   : > { %1164 = vrot.lane.b32.xlu1 %v935_v35, %s2125_s3  ;;  %v1831_v36 = vpop.f32.mrb[13].mxu0 }
 0x486   : > { %v938_v37 = vpop.f32.mrb[14].mxu0 }
 0x487   : > { %v1832_v38 = vpop.f32.mrb[15].mxu0 }
 0x4a9   : > { %v1046_v41 = vpop.f32.mrb[16].mxu0 }
 0x4aa   : > { %1168 = vrot.lane.b32.xlu0 %v1046_v41, %s2126_s27  ;;  %v1843_v42 = vpop.f32.mrb[17].mxu0  ;;  %v1748_v41 = vld [vmem:[%s632_s19] ss:$0 sm:$0xff] }
 0x4ab   : > { %v1049_v43 = vpop.f32.mrb[18].mxu0 }
 0x4ac   : > { %v1844_v44 = vpop.f32.mrb[19].mxu0 }
 0x4b1   : > { %v1157_v45 = vpop.f32.mrb[20].mxu0 }
 0x4b2   : > { %1172 = vrot.lane.b32.xlu1 %v1157_v45, %s2127_s15  ;;  %v1855_v46 = vpop.f32.mrb[21].mxu0 }
 0x4b3   : > { %v1160_v47 = vpop.f32.mrb[22].mxu0 }
 0x4b4   : > { %v1856_v48 = vpop.f32.mrb[23].mxu0 }
 0x4f7   : > { %v1165_v49 = vpop.permute.xlu1 %1164 }
 0x4f8   : > { %v1175_v51 = vsel %vm721_vm3, %v824_v31, %v1165_v49 }
 0x51c   : > { %v1169_v50 = vpop.permute.xlu0 %1168 }
 0x51d   : > { %v1177_v52 = vsel %vm1176_vm5, %v1175_v51, %v1169_v50 }
 0x524   : > { %v1173_v53 = vpop.permute.xlu1 %1172 }
 0x525   : > { %v1179_v54 = vsel %vm1178_vm6, %v1177_v52, %v1173_v53 }
 0x526   : > { %v1180_v55 = vpack.c.bf16 %v1179_v54, %v1179_v54 }
 0x528   : > { %1862 = vmatmul.mubr.msk.bf16.vlgmr.msra.gmra.mrb[12].mxu1 %vm673_vm2, %v1180_v55 }
 0x529   : > { %1889 = vmatprep.mubr.msk.bf16.mxu1 %vm2113_vm1, %v2112_v3 }
 0x5fb   : > { %v1241_v57 = vpop.f32.mrb[12].mxu1 }
 0x5fc   : > { %v1242_v58 = vadd.f32 %v1738_v56, %v1241_v57  ;;  %v1863_v59 = vpop.f32.mrb[13].mxu1 }
 0x5fd   : > { %v1244_v60 = vpop.f32.mrb[14].mxu1 }
 0x5fe   : > { %v1864_v61 = vpop.f32.mrb[15].mxu1  ;;  %v1247_v62 = vadd.f32 %v1242_v58, %v2339_v5  ;;  %v1986_v5 = vld [vmem:[%s2320_s0] sm:$0xff]  }
 0x5ff   : > { %1874 = vmatpush3.bf16.msra.mxu1 %v1986_v5  ;;  %v1757_v58 = vld [vmem:[%s635_s1] ss:$0 sm:$0xff] }
 0x600   : > { %v1250_v63 = vsel %vm673_vm2, %v1247_v62, 0.0  ;;  %1875 = vmatprep.subr.bf16.mxu1 %v2112_v3  ;;  %v1758_v60 = vld [vmem:[%s638_s7] ss:$0 sm:$0xff] }
 0x601   : > { %1251 = vadd.xlane.f32.xlu0 %v1250_v63 }
 0x603   : > { %1876 = vmatpush3.bf16.msra.mxu1 %v1987_v19 }
 0x604   : > { %1877 = vmatprep.subr.bf16.mxu1 %v2112_v3 }
 0x607   : > { %1878 = vmatpush3.bf16.msra.mxu1 %v1988_v20 }
 0x608   : > { %1879 = vmatprep.subr.bf16.mxu1 %v2112_v3 }
 0x60b   : > { %1880 = vmatpush3.bf16.msra.mxu1 %v1989_v21 }
 0x60c   : > { %1881 = vmatprep.subr.bf16.mxu1 %v2112_v3 }
 0x60f   : > { %1882 = vmatpush3.bf16.msra.mxu1 %v1990_v22 }
 0x610   : > { %1883 = vmatprep.subr.bf16.mxu1 %v2112_v3 }
 0x613   : > { %1884 = vmatpush3.bf16.msra.mxu1 %v1991_v23 }
 0x614   : > { %1885 = vmatprep.subr.bf16.mxu1 %v2112_v3 }
 0x617   : > { %1886 = vmatpush3.bf16.msra.mxu1 %v1992_v24 }
 0x618   : > { %1887 = vmatprep.subr.bf16.mxu1 %v2112_v3 }
 0x61b   : > { %1888 = vmatpush3.bf16.msra.mxu1 %v1993_v25 }
 0x68e   : > { %v1252_v0 = vpop.xlane.xlu0 %1251 }
 0x68f   : > { %v1254_v1 = vmul.f32 0.03125, %v1252_v0 }
 0x691   : > { %v1255_v2 = vsub.f32 %v1247_v62, %v1254_v1 }
 0x693   : > { %v1256_v4 = vmul.f32 %v1255_v2, %v1255_v2 }
 0x695   : > { %v1257_v6 = vsel %vm673_vm2, %v1256_v4, 0.0 }
 0x696   : > { %1258 = vadd.xlane.f32.xlu1 %v1257_v6 }
 0x723   : > { %v1259_v9 = vpop.xlane.xlu1 %1258 }
 0x724   : > { %v1260_v10 = vmul.f32 0.03125, %v1259_v9 }
 0x726   : > { %v1261_v11 = vadd.f32 1e-05, %v1260_v10 }
 0x728   : > { %2010 = vrsqrt.f32 %v1261_v11 }
 0x732   : > { %v2011_v13 = vpop.eup %2010 }
 0x733   : > { %v1263_v15 = vmul.f32 %v2011_v13, %v1255_v2 }
 0x735   : > { %v1270_v17 = vmul.f32 %v1742_v14, %v1263_v15 }
 0x737   : > { %v1277_v18 = vadd.f32 %v1743_v16, %v1270_v17 }
 0x739   : > { %v1278_v12 = vpack.c.bf16 %v1277_v18, %v1277_v18 }
 0x73b   : > { %1870 = vmatmul.mubr.msk.bf16.vlgmr.msra.gmra.mrb[24].mxu0 %vm673_vm2, %v1278_v12 }
 0x80e   : > { %v1339_v27 = vpop.f32.mrb[24].mxu0 }
 0x80f   : > { %v1340_v28 = vadd.f32 %v1744_v26, %v1339_v27  ;;  %v1871_v29 = vpop.f32.mrb[25].mxu0 }
 0x810   : > { %v1342_v30 = vpop.f32.mrb[26].mxu0 }
 0x811   : > { %v1346_v31 = vmul.f32 0.044715, %v1340_v28  ;;  %v1872_v32 = vpop.f32.mrb[27].mxu0  ;;  %v1345_v3 = vmul.f32 0.5, %v1340_v28 }
 0x813   : > { %v1347_v33 = vmul.f32 %v1346_v31, %v1340_v28 }
 0x815   : > { %v1348_v34 = vmul.f32 %v1347_v33, %v1340_v28 }
 0x817   : > { %v1349_v35 = vadd.f32 %v1348_v34, %v1340_v28 }
 0x819   : > { %v1350_v36 = vmul.f32 0.7978846, %v1349_v35 }
 0x81b   : > { %2012 = vtanh.f32 %v1350_v36 }
 0x825   : > { %v2013_v37 = vpop.eup %2012 }
 0x826   : > { %v1352_v38 = vadd.f32 1.0, %v2013_v37 }
 0x828   : > { %v1353_v39 = vmul.f32 %v1352_v38, %v1345_v3 }
 0x82a   : > { %v1354_v40 = vpack.c.bf16 %v1353_v39, %v1353_v39 }
 0x82c   : > { %1890 = vmatmul.mubr.bf16.vlgmr.msra.gmra.mrb[16].mxu1 %v1354_v40 }
 0x8ff   : > { %v1460_v42 = vpop.f32.mrb[16].mxu1 }
 0x900   : > { %v1461_v43 = vadd.f32 %v1748_v41, %v1460_v42  ;;  %v1891_v44 = vpop.f32.mrb[17].mxu1 }
 0x901   : > { %v1463_v45 = vpop.f32.mrb[18].mxu1 }
 0x902   : > { %v1892_v46 = vpop.f32.mrb[19].mxu1  ;;  %v1466_v47 = vadd.f32 %v1461_v43, %v1277_v18 }
 0x904   : > { %v1469_v48 = vsel %vm673_vm2, %v1466_v47, 0.0 }
 0x905   : > { %1470 = vadd.xlane.f32.xlu0 %v1469_v48 }
 0x992   : > { %v1471_v49 = vpop.xlane.xlu0 %1470 }
 0x993   : > { %v1472_v50 = vmul.f32 0.03125, %v1471_v49 }
 0x995   : > { %v1473_v51 = vsub.f32 %v1466_v47, %v1472_v50 }
 0x997   : > { %v1474_v52 = vmul.f32 %v1473_v51, %v1473_v51 }
 0x999   : > { %v1475_v53 = vsel %vm673_vm2, %v1474_v52, 0.0 }
 0x99a   : > { %1476 = vadd.xlane.f32.xlu0 %v1475_v53 }
 0xa27   : > { %v1477_v54 = vpop.xlane.xlu0 %1476 }
 0xa28   : > { %v1478_v55 = vmul.f32 0.03125, %v1477_v54 }
 0xa2a   : > { %v1479_v56 = vadd.f32 1e-05, %v1478_v55 }
 0xa2c   : > { %2014 = vrsqrt.f32 %v1479_v56 }
 0xa36   : > { %v2015_v57 = vpop.eup %2014 }
 0xa37   : > { %v1481_v59 = vmul.f32 %v2015_v57, %v1473_v51  ;;  %1500 = sbr.rel (%p1759_p1) target bundleno = 2637 (0xa4d), region = 80 }
 0xa39   : > { %v1488_v61 = vmul.f32 %v1757_v58, %v1481_v59 }
 0xa3b   : > { %v1495_v62 = vadd.f32 %v1758_v60, %v1488_v61 }
 0xa3d   : > { %1496 = vst.msk [vmem:[#allocation2] sm:$0xff] %vm673_vm2, %v1495_v62  ;;  %v1501_v63 = vsel (!%p1759_p1), %vm673_vm2, %v1495_v62, 0.0 }
 0xa3e   : > { %v1502_v0 = vrot.slane %v1501_v63, 4 }
 0xa40   : > { %v1503_v1 = vadd.f32 %v1502_v0, %v1501_v63 }
 0xa42   : > { %v1504_v2 = vrot.slane %v1503_v1, 2 }
 0xa44   : > { %v1505_v4 = vadd.f32 %v1504_v2, %v1503_v1 }
 0xa46   : > { %v1506_v6 = vrot.slane %v1505_v4, 1 }
 0xa48   : > { %v1507_v7 = vadd.f32 %v1506_v6, %v1505_v4 }
 0xa4a   : > { %v1509_v8 = vmul.f32 0.125, %v1507_v7 }
 0xa4c   : > { %1511 = vst.msk [vmem:[%s2332_s20] sm:$0x1] %vm1510_vm7, %v1509_v8 }
 0xa4d PF: > { %s2603_s7 = sld [smem:[#allocation9_spill]]  ;;  %s2605_s17 = sld [smem:[#allocation23_spill]] }
 0xa4e   : > { %s1525_s21 = sshll.u32 %s2332_s20, 4  ;;  %s2606_s22 = sand.u32 1, %s2086_s26   ;;  %s1526_s21 = int_to_ptr.vmem [resolvable:$true] %s1525_s21 }
 0xa4f   : > { %s1513_s12 = scalar_lea.sflag [#allocation4], %s2606_s22  ;;  %s2016_s30 = scalar_lea.vmem %s1526_s21, 16 }
 0xa50   : > { %p2017_p2 = scmp.ne.s32.totalorder %s1526_s21, %s2016_s30  ;;  %s2128_s14 = smov [#allocation3]  }
 0xa51   : > { %s2020_s25 = sshll.u32 %s2128_s14, 4  ;;  %s2021_s25 = int_to_ptr.vmem [resolvable:$false] %s2020_s25 }
 0xa52   : > { %p2018_p4 = pnand %p2017_p2, %p2248_p3  ;;  %s2022_s0 = scalar_lea.vmem %s2021_s25, 32 }
 0xa53   : > { %s1760_s1 = sshll.u32 %s2603_s7, 4  ;;  %p2023_p6 = scmp.lt.s32.totalorder %s1526_s21, %s2021_s25 }
 0xa54   : > { %s2492_s23 = scalar_lea.hbm %s2605_s17, %s1760_s1  ;;  %p2019_p5 = pneg %p2018_p4 }
 0xa55   : > { %p2024_p7 = scmp.lt.s32.totalorder %s2022_s0, %s2016_s30 }
 0xa57   : > { %p2025_p8 = por %p2024_p7, %p2023_p6 }
 0xa59   : > { %p2026_p10 = pnand %p2025_p8, %p2019_p5 }
 0xa5b   : > { %2029 = shalt.err (!%p2026_p10)
}
 0xa5c   : > { %s2030_s20 = scalar_lea.hbm %s2492_s23, 16  ;;  %s2034_s3 = scalar_lea.hbm %s2605_s17, 32 }
 0xa5d   : > { %p2031_p11 = scmp.ne.s32.totalorder %s2492_s23, %s2030_s20  ;;  %p2035_p0 = scmp.lt.u32.totalorder %s2492_s23, %s2605_s17 }
 0xa5e   : > { %p2036_p1 = scmp.lt.u32.totalorder %s2034_s3, %s2030_s20  ;;  %p2038_p4 = scmp.lt.u32.totalorder %s2030_s20, %s2492_s23 }
 0xa5f   : > { %p2032_p12 = pnand %p2031_p11, %p2248_p3 }
 0xa60   : > { %p2037_p2 = por %p2036_p1, %p2035_p0 }
 0xa61   : > { %p2033_p13 = pneg %p2032_p12 }
 0xa62   : > { %p2039_p5 = por %p2038_p4, %p2037_p2 }
 0xa64   : > { %p2040_p6 = pnand %p2039_p5, %p2033_p13 }
 0xa66   : > { %2043 = shalt.err (!%p2040_p6)
}
 0xa67   : > { %1893 = dma.vmem_to_hbm [thread:$0]  (%p2248_p3), %s1526_s21, 16, %s2492_s23, %s1513_s12  }
 0xa68 PF: > { %s2607_s29 = sld [smem:[#allocation12_spill]]  ;;  %s2608_s16 = sld [smem:[#allocation6_spill]] }
 0xa6e   : > { %p1899_p7 = scmp.ge.s32.totalorder %s2607_s29, 2  ;;  %s1537_s1 = sand.u32 1, %s2608_s16  }
 0xa6f   : > { %s1538_s24 = scalar_lea.sflag [#allocation4], %s1537_s1 }
 0xa70   : > { %p1896_p8 = pnand %p1899_p7, %p2258_p9 }
 0xa72   : > { %2077 = dma.done.wait (!%p1896_p8), %s1538_s24, 16  }
 0xa73   : > { %2079 = vsyncadd (!%p1896_p8), %s1538_s24, 4294967280  ;;  %s26_s15 = sadd.s32 1, %s2607_s29   ;;  %s2610_s28 = sld [smem:[#allocation7_spill]] }
 0xa74   : > { %p23_p10 = scmp.ge.s32.totalorder %s26_s15, 6   ;;  %s2611_s27 = sld [smem:[#allocation17_spill]] }
 0xa75   : > { %s2612_s18 = sld [smem:[#allocation10_spill]]  ;;  %s2613_s29 = sld [smem:[#allocation11_spill]] }
 0xa76   : > { %s2614_s30 = sld [smem:[#allocation13_spill]]  ;;  %s2615_s14 = sld [smem:[#allocation15_spill]] }
 0xa77   : > { %s2616_s25 = smov %s2086_s26  ;;  %25 = sbr.rel (!%p23_p10) target bundleno = 12 (0xc), region = 151 }
 0xa79   : > { %s2617_s26 = smov %s2610_s28 }
 0xa7b   : > { %s2618_s28 = smov %s2612_s18 }
 0xa7e   :  { %1542 = vsyncpa [#allocation4], 1 }
 0xa7f   :  { %1544 = vsyncpa [#allocation4 + $0x1], 1 }

</bundles_post_ra>
